<compile_context>
chip_gen: v5e
topology: v5e:2x2
jax: 0.10.0
libtpu: 0.0.40
codegen_flags: <defaults>
</compile_context>

<pallas_src>
import jax
import jax.numpy as jnp
from jax.experimental import pallas as pl
from jax.experimental.pallas import tpu as pltpu

QMIN = -128.0
QMAX = 127.0
_SCALE_EPS = 1e-12  # guard against zero calibration scales -> inf reciprocals


def _quant_elem_add_kernel(x1_ref, x2_ref, scales_ref, o_ref):
    # scales_ref: (5, C_tile, 1) -- channel axis on sublanes, so broadcasting
    # along the lane (spatial) axis is cheap (no XLU permute).
    inv_s1 = scales_ref[0]   # 1 / s1
    inv_s2 = scales_ref[1]   # 1 / s2
    r1 = scales_ref[2]       # s1 / sy
    r2 = scales_ref[3]       # s2 / sy
    s_y = scales_ref[4]      # sy

    q1 = jnp.clip(jnp.round(x1_ref[...] * inv_s1), QMIN, QMAX)
    q2 = jnp.clip(jnp.round(x2_ref[...] * inv_s2), QMIN, QMAX)
    # (q1*s1 + q2*s2) / sy  ==  q1*r1 + q2*r2   (saves one mul per element)
    y_over_sy = q1 * r1 + q2 * r2
    o_ref[...] = jnp.clip(jnp.round(y_over_sy), QMIN, QMAX) * s_y


def _round_up(x, m):
    return (x + m - 1) // m * m


def _cdiv(a, b):
    return (a + b - 1) // b


def _vmem_budget():
    """(per-streamed-input tile byte budget, scoped-VMEM limit) for this chip."""
    try:
        vmem_cap = int(pltpu.get_tpu_info().vmem_capacity_bytes)
    except Exception:
        vmem_cap = 64 * 1024 * 1024  # conservative fallback (v7x per-TC VMEM)
    if vmem_cap <= 64 * 1024 * 1024:
        # v7x: 64 MiB VMEM per TensorCore. 3 streams x 2 buffers x 3 MiB = 18 MiB.
        return 3 * 1024 * 1024, 48 * 1024 * 1024
    # v5e / v6e: 128 MiB physical VMEM. 3 x 2 x 4 MiB = 24 MiB.
    return 4 * 1024 * 1024, 64 * 1024 * 1024


def _choose_tiles(B, C, HW, tile_budget_bytes):
    """Pick (C_tile, HW_tile) for f32 tiles of (1, C_tile, HW_tile)."""
    elem_budget = max(tile_budget_bytes // 4, 8 * 128)

    # Channel tile: keep the full channel dim unless even a 128-lane slab
    # would blow the budget. Either C_tile == C (always legal) or a multiple
    # of 8 (legal even when C isn't; Pallas masks the ragged last block).
    if C <= 8 or C * 128 <= elem_budget:
        c_tile = C
    else:
        c_tile = max(8, min((elem_budget // 128) // 8 * 8, C // 8 * 8))

    # Spatial (lane) tile: largest multiple of 128 within budget, never > HW.
    if HW <= 128:
        hw_tile = HW  # full dim (legal); masked vst, unavoidable for tiny HW.
    else:
        max_lanes = max(128, (elem_budget // c_tile) // 128 * 128)
        hw_tile = min(max_lanes, HW // 128 * 128)

    # Megacore (v7x has 2 TensorCores): guarantee >= 2 grid steps.
    if B * _cdiv(C, c_tile) * _cdiv(HW, hw_tile) < 2 and HW > 128:
        hw_tile = max(128, _round_up(_cdiv(HW, 2), 128))

    return c_tile, hw_tile


def quant_elem_add(x1, x2, scale_x1, scale_x2, scale_y):
    """x1, x2: NCHW float32. scales: per-channel (dim 1), shape (C,)."""
    B, C, H, W = x1.shape
    HW = H * W

    # Contiguous NCHW -> (B, C, HW) reshape is free (no HBM pass).
    x1r = x1.astype(jnp.float32).reshape(B, C, HW)
    x2r = x2.astype(jnp.float32).reshape(B, C, HW)

    s1 = jnp.maximum(scale_x1.astype(jnp.float32).reshape(C), _SCALE_EPS)
    s2 = jnp.maximum(scale_x2.astype(jnp.float32).reshape(C), _SCALE_EPS)
    sy = jnp.maximum(scale_y.astype(jnp.float32).reshape(C), _SCALE_EPS)

    # All scale preprocessing (reciprocals + fused rescales) happens here on
    # tiny (C,) vectors; the kernel streams one packed (5, C, 1) scale block.
    scales = jnp.stack([1.0 / s1, 1.0 / s2, s1 / sy, s2 / sy, sy]).reshape(5, C, 1)

    tile_budget, vmem_limit = _vmem_budget()
    c_tile, hw_tile = _choose_tiles(B, C, HW, tile_budget)

    grid = (B, _cdiv(C, c_tile), _cdiv(HW, hw_tile))

    data_spec = pl.BlockSpec((1, c_tile, hw_tile), lambda b, c, h: (b, c, h))
    # Scale index_map is independent of b and h -> no re-DMA across inner axes.
    scale_spec = pl.BlockSpec((5, c_tile, 1), lambda b, c, h: (0, c, 0))

    out = pl.pallas_call(
        _quant_elem_add_kernel,
        out_shape=jax.ShapeDtypeStruct((B, C, HW), jnp.float32),
        grid_spec=pltpu.PrefetchScalarGridSpec(
            num_scalar_prefetch=0,
            grid=grid,
            in_specs=[data_spec, data_spec, scale_spec],
            out_specs=data_spec,
        ),
        compiler_params=pltpu.CompilerParams(
            dimension_semantics=("parallel", "parallel", "parallel"),
            vmem_limit_bytes=vmem_limit,
        ),
    )(x1r, x2r, scales)

    return out.reshape(B, C, H, W)


def _per_channel_scale(x):
    """Simulated calibration: symmetric per-channel scale over (N, H, W)."""
    max_abs = jnp.max(jnp.abs(x), axis=(0, 2, 3))
    return jnp.maximum(max_abs, 1e-8) / QMAX


def _reference(x1, x2, s1, s2, sy):
    """Divide-based reference matching the PyTorch quant/dequant path."""
    s1 = s1.reshape(1, -1, 1, 1)
    s2 = s2.reshape(1, -1, 1, 1)
    sy = sy.reshape(1, -1, 1, 1)
    x1_fp = jnp.clip(jnp.round(x1 / s1), QMIN, QMAX) * s1
    x2_fp = jnp.clip(jnp.round(x2 / s2), QMIN, QMAX) * s2
    y = x1_fp + x2_fp
    return jnp.clip(jnp.round(y / sy), QMIN, QMAX) * sy


if __name__ == "__main__":
    key = jax.random.PRNGKey(0)
    k1, k2 = jax.random.split(key)

    B, C, H, W = 2, 4, 16, 16
    x1 = jax.random.normal(k1, (B, C, H, W), dtype=jnp.float32)
    x2 = jax.random.normal(k2, (B, C, H, W), dtype=jnp.float32)

    # Deterministic "calibrated" quantizer parameters (per-channel scales).
    scale_x1 = _per_channel_scale(x1)
    scale_x2 = _per_channel_scale(x2)
    scale_y = _per_channel_scale(x1 + x2)

    y_fp = quant_elem_add(x1, x2, scale_x1, scale_x2, scale_y)
    y_fp = jax.block_until_ready(y_fp)

    y_ref = _reference(x1, x2, scale_x1, scale_x2, scale_y)
    assert y_fp.shape == (B, C, H, W)

    # Reciprocal-multiply vs divide may flip a rounding at an exact .5
    # boundary: allow rare <= ~2-LSB deviations, everything else must match.
    diff = jnp.abs(y_fp - y_ref)
    lsb = scale_y.reshape(1, -1, 1, 1)
    assert bool(jnp.all(diff <= 2.5 * lsb + 1e-5))
    frac_off = float(jnp.mean((diff > 1e-5).astype(jnp.float32)))
    assert frac_off < 0.01

    # TODO(synk): `_forward_intinfer` is `pass` in the reference module (no-op),
    # and calibration-mode statistics/log_info are host-side bookkeeping, so
    # only the fake-quant (qnet) forward path is implemented.
    print("KERNEL_OK")
</pallas_src>

<mosaic_0001>
module attributes {stable_mosaic.version = 11 : i64} {
  func.func @_quant_elem_add_kernel(%arg0: i32, %arg1: i32, %arg2: i32, %arg3: memref<1x4x256xf32, #tpu.memory_space<vmem>>, %arg4: memref<1x4x256xf32, #tpu.memory_space<vmem>>, %arg5: memref<5x4x1xf32, #tpu.memory_space<vmem>>, %arg6: memref<1x4x256xf32, #tpu.memory_space<vmem>>) attributes {dimension_semantics = [#tpu.dimension_semantics<parallel>, #tpu.dimension_semantics<parallel>, #tpu.dimension_semantics<parallel>], iteration_bounds = array<i64: 2, 1, 1>, scalar_prefetch = 0 : i64, scratch_operands = 0 : i64, tpu.core_type = #tpu.core_type<tc>, window_params = [{transform_indices = @transform_0, window_bounds = array<i64: 1, 4, 256>}, {transform_indices = @transform_1, window_bounds = array<i64: 1, 4, 256>}, {transform_indices = @transform_2, window_bounds = array<i64: 5, 4, 1>}, {transform_indices = @transform_3, window_bounds = array<i64: 1, 4, 256>}]} {
    %c0 = arith.constant 0 : index
    %c0_0 = arith.constant 0 : index
    %c0_1 = arith.constant 0 : index
    %0 = vector.load %arg5[%c0, %c0_0, %c0_1] : memref<5x4x1xf32, #tpu.memory_space<vmem>>, vector<1x4x1xf32>
    %1 = vector.shape_cast %0 : vector<1x4x1xf32> to vector<4x1xf32>
    %c1 = arith.constant 1 : index
    %c0_2 = arith.constant 0 : index
    %c0_3 = arith.constant 0 : index
    %2 = vector.load %arg5[%c1, %c0_2, %c0_3] : memref<5x4x1xf32, #tpu.memory_space<vmem>>, vector<1x4x1xf32>
    %3 = vector.shape_cast %2 : vector<1x4x1xf32> to vector<4x1xf32>
    %c2 = arith.constant 2 : index
    %c0_4 = arith.constant 0 : index
    %c0_5 = arith.constant 0 : index
    %4 = vector.load %arg5[%c2, %c0_4, %c0_5] : memref<5x4x1xf32, #tpu.memory_space<vmem>>, vector<1x4x1xf32>
    %5 = vector.shape_cast %4 : vector<1x4x1xf32> to vector<4x1xf32>
    %c3 = arith.constant 3 : index
    %c0_6 = arith.constant 0 : index
    %c0_7 = arith.constant 0 : index
    %6 = vector.load %arg5[%c3, %c0_6, %c0_7] : memref<5x4x1xf32, #tpu.memory_space<vmem>>, vector<1x4x1xf32>
    %7 = vector.shape_cast %6 : vector<1x4x1xf32> to vector<4x1xf32>
    %c4 = arith.constant 4 : index
    %c0_8 = arith.constant 0 : index
    %c0_9 = arith.constant 0 : index
    %8 = vector.load %arg5[%c4, %c0_8, %c0_9] : memref<5x4x1xf32, #tpu.memory_space<vmem>>, vector<1x4x1xf32>
    %9 = vector.shape_cast %8 : vector<1x4x1xf32> to vector<4x1xf32>
    %c0_10 = arith.constant 0 : index
    %c0_11 = arith.constant 0 : index
    %c0_12 = arith.constant 0 : index
    %10 = vector.load %arg3[%c0_10, %c0_11, %c0_12] : memref<1x4x256xf32, #tpu.memory_space<vmem>>, vector<1x4x256xf32>
    %11 = vector.shape_cast %1 : vector<4x1xf32> to vector<1x4x1xf32>
    %12 = vector.broadcast %11 : vector<1x4x1xf32> to vector<1x4x256xf32>
    %13 = arith.mulf %10, %12 : vector<1x4x256xf32>
    %14 = math.roundeven %13 : vector<1x4x256xf32>
    %cst = arith.constant -1.280000e+02 : f32
    %cst_13 = arith.constant 1.270000e+02 : f32
    %15 = vector.broadcast %cst : f32 to vector<1x4x256xf32>
    %16 = arith.maximumf %15, %14 : vector<1x4x256xf32>
    %17 = vector.broadcast %cst_13 : f32 to vector<1x4x256xf32>
    %18 = arith.minimumf %17, %16 : vector<1x4x256xf32>
    %c0_14 = arith.constant 0 : index
    %c0_15 = arith.constant 0 : index
    %c0_16 = arith.constant 0 : index
    %19 = vector.load %arg4[%c0_14, %c0_15, %c0_16] : memref<1x4x256xf32, #tpu.memory_space<vmem>>, vector<1x4x256xf32>
    %20 = vector.shape_cast %3 : vector<4x1xf32> to vector<1x4x1xf32>
    %21 = vector.broadcast %20 : vector<1x4x1xf32> to vector<1x4x256xf32>
    %22 = arith.mulf %19, %21 : vector<1x4x256xf32>
    %23 = math.roundeven %22 : vector<1x4x256xf32>
    %cst_17 = arith.constant -1.280000e+02 : f32
    %cst_18 = arith.constant 1.270000e+02 : f32
    %24 = vector.broadcast %cst_17 : f32 to vector<1x4x256xf32>
    %25 = arith.maximumf %24, %23 : vector<1x4x256xf32>
    %26 = vector.broadcast %cst_18 : f32 to vector<1x4x256xf32>
    %27 = arith.minimumf %26, %25 : vector<1x4x256xf32>
    %28 = vector.shape_cast %5 : vector<4x1xf32> to vector<1x4x1xf32>
    %29 = vector.broadcast %28 : vector<1x4x1xf32> to vector<1x4x256xf32>
    %30 = arith.mulf %18, %29 : vector<1x4x256xf32>
    %31 = vector.shape_cast %7 : vector<4x1xf32> to vector<1x4x1xf32>
    %32 = vector.broadcast %31 : vector<1x4x1xf32> to vector<1x4x256xf32>
    %33 = arith.mulf %27, %32 : vector<1x4x256xf32>
    %34 = arith.addf %30, %33 : vector<1x4x256xf32>
    %35 = math.roundeven %34 : vector<1x4x256xf32>
    %cst_19 = arith.constant -1.280000e+02 : f32
    %cst_20 = arith.constant 1.270000e+02 : f32
    %36 = vector.broadcast %cst_19 : f32 to vector<1x4x256xf32>
    %37 = arith.maximumf %36, %35 : vector<1x4x256xf32>
    %38 = vector.broadcast %cst_20 : f32 to vector<1x4x256xf32>
    %39 = arith.minimumf %38, %37 : vector<1x4x256xf32>
    %40 = vector.shape_cast %9 : vector<4x1xf32> to vector<1x4x1xf32>
    %41 = vector.broadcast %40 : vector<1x4x1xf32> to vector<1x4x256xf32>
    %42 = arith.mulf %39, %41 : vector<1x4x256xf32>
    %c0_21 = arith.constant 0 : index
    %c0_22 = arith.constant 0 : index
    %c0_23 = arith.constant 0 : index
    %43 = vector.load %arg6[%c0_21, %c0_22, %c0_23] : memref<1x4x256xf32, #tpu.memory_space<vmem>>, vector<1x4x256xf32>
    tpu.vector_store %arg6[%c0_21, %c0_22, %c0_23], %42 {strides = array<i32>} : memref<1x4x256xf32, #tpu.memory_space<vmem>>, vector<1x4x256xf32>,
    return
  }
  func.func @transform_0(%arg0: i32, %arg1: i32, %arg2: i32) -> (i32, i32, i32) {
    %c0_i32 = arith.constant 0 : i32
    return %arg0, %arg1, %arg2 : i32, i32, i32
  }
  func.func @transform_1(%arg0: i32, %arg1: i32, %arg2: i32) -> (i32, i32, i32) {
    %c0_i32 = arith.constant 0 : i32
    return %arg0, %arg1, %arg2 : i32, i32, i32
  }
  func.func @transform_2(%arg0: i32, %arg1: i32, %arg2: i32) -> (i32, i32, i32) {
    %c0_i32 = arith.constant 0 : i32
    %c0_i32_0 = arith.constant 0 : i32
    %c0_i32_1 = arith.constant 0 : i32
    return %c0_i32, %arg1, %c0_i32_0 : i32, i32, i32
  }
  func.func @transform_3(%arg0: i32, %arg1: i32, %arg2: i32) -> (i32, i32, i32) {
    %c0_i32 = arith.constant 0 : i32
    return %arg0, %arg1, %arg2 : i32, i32, i32
  }
}

</mosaic_0001>

<bundles_post_ra>
// kernel: tpu_custom_call.1
= control target key start
LH: loop header
LB: loop body
LE: loop exit
PB: predicated region body
PF: predicated region fallthrough
CT: control target
= control target key end

     0   :  { %8 = vsyncpa [#allocation3], 0  ;;  %s908_s0 = inlined_call_operand.vmem [shape: f32[2,4,256], index: 0, kind: input, shape index: {}]   ;;  %s909_s1 = inlined_call_operand.hbm [shape: f32[2,4,256], index: 1, kind: input, shape index: {}]   ;;  %s910_s2 = inlined_call_operand.vmem [shape: f32[5,4,1], index: 2, kind: input, shape index: {}]   ;;  %s911_s3 = inlined_call_operand.hbm [shape: f32[2,4,256], index: 3, kind: output, shape index: {}]  }
   0x1   :  { %10 = vsyncpa [#allocation3 + $0x1], 0 }
   0x2   :  { %11 = vsyncpa [#allocation4], 0 }
   0x3   :  { %13 = vsyncpa [#allocation4 + $0x1], 0  ;;  %s764_s12 = smov 0   ;;  %s766_s13 = smov 0  }
   0x4   :  { %s768_s14 = smov 0   ;;  %s770_s15 = smov 0  }
   0x5   :  { %s772_s16 = smov 0   ;;  %s774_s17 = smov 0  }
   0x6 LB: > { %s512_s18 = sadd.s32 4294967295, %s740_s17   ;;  %s513_s19 = sadd.s32 4294967294, %s740_s17   ;;  %s740_s17 = sphi %s774_s17, %s19_s17   ;;  %s736_s16 = sphi %s772_s16, %s920_s16   ;;  %s732_s15 = sphi %s770_s15, %s919_s15   ;;  %s728_s14 = sphi %s768_s14, %s918_s14   ;;  %s724_s13 = sphi %s766_s13, %s917_s13   ;;  %s720_s12 = sphi %s764_s12, %s916_s12  }
   0x7   : > { %s38_s20 = sadd.s32 1, %s736_s16  ;;  %s79_s21 = sadd.s32 1, %s728_s14 }
   0x8   : > { %p40_p0 = scmp.ge.s32.totalorder %s38_s20, 2  ;;  %p86_p1 = scmp.ne.s32.totalorder %s728_s14, %s724_s13 }
   0x9   : > { %p87_p2 = scmp.eq.s32.totalorder %s740_s17, 0  ;;  %p92_p3 = scmp.ne.s32.totalorder %s724_s13, %s720_s12 }
   0xa   : > { %s922_s20 = smov (%p40_p0, %s38_s20), 0  ;;  %p93_p5 = scmp.eq.s32.totalorder %s512_s18, 0 }
   0xb   : > { %p805_p4 = por %p87_p2, %p86_p1  ;;  %s72_s23 = ssub.s32 %s736_s16, %s922_s20 }
   0xc   : > { %p146_p6 = scmp.eq.s32.totalorder %s512_s18, 1  ;;  %p77_p7 = scmp.eq.s32.totalorder %s72_s23, 0 }
   0xd   : > { %p811_p8 = por %p93_p5, %p92_p3  ;;  %p152_p10 = scmp.eq.s32.totalorder %s513_s19, 1 }
   0xe   : > { %p815_p9 = por %p146_p6, %p86_p1  ;;  %p516_p12 = scmp.ge.s32.totalorder %s740_s17, 2 }
   0xf   : > { %s820_s26 = scalar_select %p77_p7, %s728_s14, %s79_s21  }
  0x10   : > { %p822_p11 = por %p152_p10, %p92_p3  ;;  %p573_p13 = scmp.lt.s32.totalorder %s740_s17, 2 }
  0x11   : > { %s196_s28 = sand.u32 1, %s728_s14   ;;  %s534_s30 = sshll.u32 %s736_s16, 3 }
  0x12   : > { %s517_s29 = sshll.u32 %s196_s28, 3  ;;  %s209_s6 = scalar_lea.hbm %s909_s1, %s534_s30 }
  0x13   : > { %s200_s7 = scalar_lea.vmem [#allocation2], %s517_s29  ;;  %s211_s9 = sshll.u32 %s209_s6, 4  ;;  %s212_s9 = int_to_ptr.hbm [resolvable:$true] %s211_s9 }
  0x14   : > { %s213_s8 = sshll.u32 %s200_s7, 4  ;;  %p566_p0 = pnand %p573_p13, %p805_p4  ;;  %s214_s8 = int_to_ptr.vmem [resolvable:$true] %s213_s8 }
  0x15   : > { %p520_p1 = scmp.ge.s32.totalorder %s740_s17, 1  ;;  %p218_p2 = scmp.lt.s32.totalorder %s740_s17, 3 }
  0x16   : > { %s197_s10 = scalar_lea.sflag [#allocation3], %s196_s28 }
  0x17   : > { %568 = dma.hbm_to_vmem [thread:$0]  (!%p566_p0), %s212_s9, 128, %s214_s8, %s197_s10  }
  0x18   : > { %p219_p3 = pnand %p520_p1, %p218_p2 }
  0x19   : > { %s838_s11 = sand.u32 (!%p219_p3), 1, %s724_s13  }
  0x1a   : > { %222 = sbr.rel (%p219_p3) target bundleno = 196 (0xc4), region = 32  ;;  %s521_s18 = sshll.u32 (!%p219_p3), %s838_s11, 3 }
  0x1b   : > { %s225_s19 = scalar_lea.sflag (!%p219_p3), [#allocation3], %s838_s11  ;;  %s228_s21 = scalar_lea.vmem (!%p219_p3), [#allocation2], %s521_s18 }
  0x1f   : > { %711 = dma.done.wait (%p811_p8), %s225_s19, 128  }
  0x20   : > { %713 = vsyncadd (%p811_p8), %s225_s19, 4294967168  ;;  %v742_v0 = vmov 0   ;;  %v289_v1 = vld [vmem:[%s910_s2] sm:$0xf]  ;;  %v526_v2 = vld [vmem:[%s910_s2 + $0x8] sm:$0xf] }
  0x21   : > { %625 = vset.pattern.permute.xlu0 %v742_v0  ;;  %626 = vset.pattern.permute.xlu1 %v742_v0  ;;  %v528_v3 = vld [vmem:[%s910_s2 + $0x10] sm:$0xf]  ;;  %v525_v4 = vld [vmem:[%s910_s2 + $0x4] sm:$0xf]  ;;  %v527_v5 = vld [vmem:[%s910_s2 + $0xc] sm:$0xf] }
  0x22   : > { %627 = vset.pattern.permute.xlu2 %v742_v0  ;;  %301 = vperm.xlu0 %625, %v289_v1   ;;  %p270_p4 = scmp.lt.s32.totalorder %s732_s15, 1  ;;  %v743_v6 = vmov 839922192   ;;  %v312_v15 = vld [vmem:[%s228_s21] sm:$0xff]  ;;  %s536_s21 = sshll.u32 %s732_s15, 3 }
  0x23   : > { %328 = vperm.xlu1 %626, %v526_v2   ;;  %352 = vperm.xlu2 %627, %v528_v3   ;;  %v304_v7 = vunpack.c.l.s4 %v743_v6  ;;  %s377_s29 = scalar_lea.hbm %s911_s3, %s536_s21  ;;  %s268_s30 = scalar_lea.vmem [#allocation5], %s521_s18 }
  0x24   : > { %s271_s8 = scalar_select %p270_p4, %s732_s15, 1 }
  0x25   : > { %v305_v8 = vunpack.c.0.s8 %v304_v7  ;;  %s379_s4 = sshll.u32 %s268_s30, 4  ;;  %s381_s24 = sshll.u32 %s377_s29, 4  ;;  %s380_s4 = int_to_ptr.vmem [resolvable:$true] %s379_s4  ;;  %s382_s24 = int_to_ptr.hbm [resolvable:$true] %s381_s24 }
  0x26   : > { %s535_s9 = sshll.u32 %s271_s8, 3  ;;  %s362_s15 = scalar_lea.sflag [#allocation4], %s838_s11 }
  0x27   : > { %s281_s22 = scalar_lea.vmem %s908_s0, %s535_s9  ;;  %s672_s5 = sshra.s32 %s382_s24, 4  ;;  %s673_s5 = int_to_ptr.hbm [resolvable:$true] %s672_s5 }
  0x28   : > { %v298_v9 = vld [vmem:[%s281_s22] sm:$0xff]  ;;  %s674_s6 = scalar_lea.hbm %s673_s5, 8  ;;  %s678_s9 = scalar_lea.hbm %s911_s3, 16 }
  0x29   : > { %p675_p5 = scmp.ne.s32.totalorder %s673_s5, %s674_s6  ;;  %p679_p8 = scmp.lt.s32.totalorder %s673_s5, %s911_s3 }
  0x2a   : > { %315 = vperm.xlu0 %625, %v525_v4   ;;  %p680_p10 = scmp.lt.s32.totalorder %s678_s9, %s674_s6 }
  0x2b   : > { %338 = vperm.xlu1 %626, %v527_v5   ;;  %p676_p6 = pnand %p675_p5, %p815_p9 }
  0x2c   : > { %p681_p13 = por %p680_p10, %p679_p8 }
  0x2d   : > { %p677_p7 = pneg %p676_p6 }
  0x2f   : > { %p682_p0 = pnand %p681_p13, %p677_p7 }
  0x7d   : > { %v353_v47 = vpop.permute.xlu2 %352 }
  0x7e   : > { %v357_v51 = vperm.slane %v353_v47, %v305_v8 }
  0x94   : > { %v302_v10 = vpop.permute.xlu0 %301 }
  0x95   : > { %v306_v11 = vperm.slane %v302_v10, %v305_v8  ;;  %v329_v21 = vpop.permute.xlu1 %328 }
  0x96   : > { %v333_v35 = vperm.slane %v329_v21, %v305_v8 }
  0x97   : > { %v308_v12 = vmul.f32 %v306_v11, %v298_v9 }
  0x99   : > { %v539_v13 = vcvt.f32.s32 %v308_v12  ;;  %v542_v18 = vand.u32 2147483648, %v308_v12  ;;  %v537_v20 = vand.u32 2147483647, %v308_v12 }
  0x9b   : > { %v540_v14 = vcvt.s32.f32 %v539_v13  ;;  %vm538_vm0 = vcmp.lt.f32.partialorder %v537_v20, 8388608.0 }
  0x9c   : > { %v316_v16 = vpop.permute.xlu0 %315 }
  0x9d   : > { %v541_v17 = vand.u32 2147483647, %v540_v14  ;;  %v320_v19 = vperm.slane %v316_v16, %v305_v8  ;;  %v339_v32 = vpop.permute.xlu1 %338 }
  0x9e   : > { %v343_v38 = vperm.slane %v339_v32, %v305_v8 }
  0x9f   : > { %v543_v22 = vor.u32 %v542_v18, %v541_v17  ;;  %v322_v23 = vmul.f32 %v320_v19, %v312_v15 }
  0xa1   : > { %v547_v24 = vcvt.f32.s32 %v322_v23  ;;  %v544_v25 = vsel %vm538_vm0, %v543_v22, %v308_v12  ;;  %v545_v27 = vand.u32 2147483647, %v322_v23  ;;  %v550_v29 = vand.u32 2147483648, %v322_v23 }
  0xa2   : > { %v310_v30 = vmax.f32 %v544_v25, -128.0 }
  0xa3   : > { %v548_v26 = vcvt.s32.f32 %v547_v24  ;;  %vm546_vm1 = vcmp.lt.f32.partialorder %v545_v27, 8388608.0 }
  0xa4   : > { %v311_v34 = vmin.f32 %v310_v30, 127.0 }
  0xa5   : > { %v549_v28 = vand.u32 2147483647, %v548_v26 }
  0xa6   : > { %v335_v39 = vmul.f32 %v333_v35, %v311_v34 }
  0xa7   : > { %v551_v31 = vor.u32 %v550_v29, %v549_v28 }
  0xa9   : > { %v552_v33 = vsel %vm546_vm1, %v551_v31, %v322_v23 }
  0xaa   : > { %v324_v36 = vmax.f32 %v552_v33, -128.0 }
  0xac   : > { %v325_v37 = vmin.f32 %v324_v36, 127.0 }
  0xae   : > { %v345_v40 = vmul.f32 %v343_v38, %v325_v37 }
  0xb0   : > { %v346_v41 = vadd.f32 %v345_v40, %v335_v39 }
  0xb2   : > { %v555_v42 = vcvt.f32.s32 %v346_v41  ;;  %v553_v44 = vand.u32 2147483647, %v346_v41  ;;  %v558_v46 = vand.u32 2147483648, %v346_v41 }
  0xb4   : > { %v556_v43 = vcvt.s32.f32 %v555_v42  ;;  %vm554_vm2 = vcmp.lt.f32.partialorder %v553_v44, 8388608.0 }
  0xb6   : > { %v557_v45 = vand.u32 2147483647, %v556_v43 }
  0xb8   : > { %v559_v48 = vor.u32 %v558_v46, %v557_v45 }
  0xba   : > { %v560_v49 = vsel %vm554_vm2, %v559_v48, %v346_v41 }
  0xbb   : > { %v348_v50 = vmax.f32 %v560_v49, -128.0 }
  0xbd   : > { %v349_v52 = vmin.f32 %v348_v50, 127.0 }
  0xbf   : > { %v359_v53 = vmul.f32 %v357_v51, %v349_v52 }
  0xc1   : > { %360 = vst [vmem:[%s268_s30] sm:$0xff] %v359_v53 }
  0xc2   : > { %685 = shalt.err (!%p682_p0)
}
  0xc3   : > { %563 = dma.vmem_to_hbm [thread:$0]  (%p815_p9), %s380_s4, 128, %s382_s24, %s362_s15  }
  0xc4 PF: > { %s393_s11 = sand.u32 1, %s720_s12   ;;  %p570_p1 = pnand %p516_p12, %p822_p11 }
  0xc5   : > { %s394_s19 = scalar_lea.sflag [#allocation4], %s393_s11 }
  0xc6   : > { %p571_p2 = pneg %p570_p1 }
  0xc8   : > { %715 = dma.done.wait (%p571_p2), %s394_s19, 128  }
  0xc9   : > { %717 = vsyncadd (%p571_p2), %s394_s19, 4294967168  ;;  %s19_s17 = sadd.s32 1, %s740_s17   ;;  %s916_s12 = smov %s724_s13 }
  0xca   : > { %p16_p3 = scmp.ge.s32.totalorder %s19_s17, 4   ;;  %s917_s13 = smov %s728_s14 }
  0xcb   : > { %s918_s14 = smov %s820_s26  ;;  %s919_s15 = smov %s736_s16 }
  0xcc   : > { %s920_s16 = smov %s922_s20  ;;  %18 = sbr.rel (!%p16_p3) target bundleno = 6 (0x6), region = 87 }
  0xd1   :  { %400 = vsyncpa [#allocation3], 1 }
  0xd2   :  { %402 = vsyncpa [#allocation3 + $0x1], 1 }
  0xd3   :  { %403 = vsyncpa [#allocation4], 1 }
  0xd4   :  { %405 = vsyncpa [#allocation4 + $0x1], 1 }

</bundles_post_ra>
